<compile_context>
chip_gen: v7x
topology: tpu7x:2x2x1
jax: 0.10.0
libtpu: 0.0.40
codegen_flags: <defaults>
</compile_context>

<pallas_src>
import functools

import jax
import jax.numpy as jnp
from jax.experimental import pallas as pl
from jax.experimental.pallas import tpu as pltpu

LANE = 128
SUBLANE = 8


def _round_up(x, m):
    return ((x + m - 1) // m) * m


def dan2_kernel(ids_ref, table_ref, w1_ref, b1_ref, w2_ref, b2_ref, out_ref,
                *, out_size):
    ids = ids_ref[...]                        # [TB, L] int32
    TB, L = ids.shape
    V_pad = table_ref.shape[0]
    OUT_pad = out_ref.shape[1]

    # --- Embedding lookup + mean over seq as a 2-D one-hot count matmul ---
    # counts[b, v] = #occurrences of token v in row b  (pad tokens never match
    # real lanes; out-of-range ids simply contribute nothing).
    lane_v = jax.lax.broadcasted_iota(jnp.int32, (TB, V_pad), 1)   # hoisted
    counts = jnp.zeros((TB, V_pad), dtype=jnp.float32)
    for l in range(L):                                             # unrolled
        counts = counts + (lane_v == ids[:, l:l + 1]).astype(jnp.float32)

    # mean(embeddings, dim=1) == (counts @ table) / L      -> MXU
    avg = jnp.dot(counts, table_ref[...],
                  preferred_element_type=jnp.float32) * (1.0 / L)  # [TB, D_pad]

    # --- Linear(D, H) + ReLU ---
    h = jnp.dot(avg, w1_ref[...], preferred_element_type=jnp.float32)
    h = jnp.maximum(h + b1_ref[...], 0.0)                          # [TB, H_pad]

    # --- Linear(H, OUT) + ReLU  (OUT padded to 128 lanes, pad cols are 0) ---
    logits = jnp.dot(h, w2_ref[...], preferred_element_type=jnp.float32)
    logits = jnp.maximum(logits + b2_ref[...], 0.0)                # [TB, OUT_pad]

    # --- Mask pad lanes, then LogSoftmax over the (padded) class dim ---
    lane_o = jax.lax.broadcasted_iota(jnp.int32, (TB, OUT_pad), 1)
    logits = jnp.where(lane_o < out_size, logits, jnp.float32(-1e30))
    m = jnp.max(logits, axis=1, keepdims=True)
    z = logits - m
    lse = jnp.log(jnp.sum(jnp.exp(z), axis=1, keepdims=True))
    out_ref[...] = z - lse


def dan2_forward(ids, table, w1, b1, w2, b2, *, batch_tile=128):
    B, L = ids.shape
    V, D = table.shape
    H = w1.shape[1]
    OUT = w2.shape[1]

    # Lane-align all contraction / output dims; pad batch to the tile.
    V_pad = _round_up(V, LANE)
    D_pad = _round_up(D, LANE)
    H_pad = _round_up(H, LANE)
    OUT_pad = LANE                                  # lane-dense output block

    B_pad = _round_up(B, SUBLANE)
    TB = min(batch_tile, B_pad)
    B_pad = _round_up(B_pad, TB)
    grid = (B_pad // TB,)

    f32 = jnp.float32
    ids_p = jnp.zeros((B_pad, L), jnp.int32).at[:B, :].set(ids.astype(jnp.int32))
    table_p = jnp.zeros((V_pad, D_pad), f32).at[:V, :D].set(table.astype(f32))
    w1_p = jnp.zeros((D_pad, H_pad), f32).at[:D, :H].set(w1.astype(f32))
    b1_p = jnp.zeros((1, H_pad), f32).at[0, :H].set(b1.reshape(-1).astype(f32))
    w2_p = jnp.zeros((H_pad, OUT_pad), f32).at[:H, :OUT].set(w2.astype(f32))
    b2_p = jnp.zeros((1, OUT_pad), f32).at[0, :OUT].set(b2.reshape(-1).astype(f32))

    grid_spec = pltpu.PrefetchScalarGridSpec(
        num_scalar_prefetch=0,
        grid=grid,
        in_specs=[
            pl.BlockSpec((TB, L), lambda i: (i, 0)),          # ids: tiled over batch
            pl.BlockSpec((V_pad, D_pad), lambda i: (0, 0)),   # weights stay resident
            pl.BlockSpec((D_pad, H_pad), lambda i: (0, 0)),
            pl.BlockSpec((1, H_pad), lambda i: (0, 0)),
            pl.BlockSpec((H_pad, OUT_pad), lambda i: (0, 0)),
            pl.BlockSpec((1, OUT_pad), lambda i: (0, 0)),
        ],
        out_specs=pl.BlockSpec((TB, OUT_pad), lambda i: (i, 0)),
    )

    out_padded = pl.pallas_call(
        functools.partial(dan2_kernel, out_size=OUT),
        out_shape=jax.ShapeDtypeStruct((B_pad, OUT_pad), jnp.float32),
        grid_spec=grid_spec,
        compiler_params=pltpu.CompilerParams(
            dimension_semantics=("parallel",)),
    )(ids_p, table_p, w1_p, b1_p, w2_p, b2_p)

    return out_padded[:B, :OUT]


def reference_forward(ids, table, w1, b1, w2, b2):
    emb = jnp.take(table, ids, axis=0)            # [B, L, D]
    avg = jnp.mean(emb, axis=1)                   # [B, D]
    h = jnp.maximum(avg @ w1 + b1.reshape(1, -1), 0.0)
    logits = jnp.maximum(h @ w2 + b2.reshape(1, -1), 0.0)
    return jax.nn.log_softmax(logits, axis=1)


if __name__ == "__main__":
    # Small shapes consistent with the module: GloVe 50-d embeddings,
    # hidden_size=100 (module default), output_size=2, toy vocab V=64.
    B, L, V, D, H, OUT = 8, 8, 64, 50, 100, 2

    key = jax.random.PRNGKey(0)
    k_ids, k_tab, k_w1, k_b1, k_w2, k_b2 = jax.random.split(key, 6)

    ids = jax.random.randint(k_ids, (B, L), 0, V, dtype=jnp.int32)
    table = jax.random.normal(k_tab, (V, D), dtype=jnp.float32) * 0.1
    w1 = jax.random.normal(k_w1, (D, H), dtype=jnp.float32) * 0.1
    b1 = jax.random.normal(k_b1, (H,), dtype=jnp.float32) * 0.1
    w2 = jax.random.normal(k_w2, (H, OUT), dtype=jnp.float32) * 0.1
    b2 = jax.random.normal(k_b2, (OUT,), dtype=jnp.float32) * 0.1

    out = dan2_forward(ids, table, w1, b1, w2, b2)
    out = jax.block_until_ready(out)

    ref = reference_forward(ids, table, w1, b1, w2, b2)
    assert out.shape == (B, OUT)
    assert jnp.allclose(out, ref, atol=2e-5, rtol=2e-5), "mismatch vs reference"

    print("KERNEL_OK")
</pallas_src>

<mosaic_0001>
module attributes {stable_mosaic.version = 11 : i64} {
  func.func @dan2_kernel(%arg0: i32, %arg1: memref<8x8xi32, #tpu.memory_space<vmem>>, %arg2: memref<128x128xf32, #tpu.memory_space<vmem>>, %arg3: memref<128x128xf32, #tpu.memory_space<vmem>>, %arg4: memref<1x128xf32, #tpu.memory_space<vmem>>, %arg5: memref<128x128xf32, #tpu.memory_space<vmem>>, %arg6: memref<1x128xf32, #tpu.memory_space<vmem>>, %arg7: memref<8x128xf32, #tpu.memory_space<vmem>>) attributes {dimension_semantics = [#tpu.dimension_semantics<parallel>], iteration_bounds = array<i64: 1>, scalar_prefetch = 0 : i64, scratch_operands = 0 : i64, tpu.core_type = #tpu.core_type<tc>, window_params = [{transform_indices = @transform_0, window_bounds = array<i64: 8, 8>}, {pipeline_mode = #tpu.pipeline_mode<synchronous>, transform_indices = @transform_1, window_bounds = array<i64: 128, 128>}, {pipeline_mode = #tpu.pipeline_mode<synchronous>, transform_indices = @transform_2, window_bounds = array<i64: 128, 128>}, {pipeline_mode = #tpu.pipeline_mode<synchronous>, transform_indices = @transform_3, window_bounds = array<i64: 1, 128>}, {pipeline_mode = #tpu.pipeline_mode<synchronous>, transform_indices = @transform_4, window_bounds = array<i64: 128, 128>}, {pipeline_mode = #tpu.pipeline_mode<synchronous>, transform_indices = @transform_5, window_bounds = array<i64: 1, 128>}, {transform_indices = @transform_6, window_bounds = array<i64: 8, 128>}]} {
    %c0 = arith.constant 0 : index
    %c0_0 = arith.constant 0 : index
    %0 = vector.load %arg1[%c0, %c0_0] : memref<8x8xi32, #tpu.memory_space<vmem>>, vector<8x8xi32>
    %1 = tpu.iota {dimensions = array<i32: 1>} : vector<8x128xi32>
    %cst = arith.constant 0.000000e+00 : f32
    %2 = vector.broadcast %cst : f32 to vector<8x128xf32>
    %3 = vector.extract_strided_slice %0 {offsets = [0, 0], sizes = [8, 1], strides = [1, 1]} : vector<8x8xi32> to vector<8x1xi32>
    %4 = vector.broadcast %3 : vector<8x1xi32> to vector<8x128xi32>
    %5 = arith.cmpi eq, %1, %4 : vector<8x128xi32>
    %6 = arith.extui %5 : vector<8x128xi1> to vector<8x128xi32>
    %7 = arith.sitofp %6 : vector<8x128xi32> to vector<8x128xf32>
    %8 = arith.addf %2, %7 : vector<8x128xf32>
    %9 = vector.extract_strided_slice %0 {offsets = [0, 1], sizes = [8, 1], strides = [1, 1]} : vector<8x8xi32> to vector<8x1xi32>
    %10 = vector.broadcast %9 : vector<8x1xi32> to vector<8x128xi32>
    %11 = arith.cmpi eq, %1, %10 : vector<8x128xi32>
    %12 = arith.extui %11 : vector<8x128xi1> to vector<8x128xi32>
    %13 = arith.sitofp %12 : vector<8x128xi32> to vector<8x128xf32>
    %14 = arith.addf %8, %13 : vector<8x128xf32>
    %15 = vector.extract_strided_slice %0 {offsets = [0, 2], sizes = [8, 1], strides = [1, 1]} : vector<8x8xi32> to vector<8x1xi32>
    %16 = vector.broadcast %15 : vector<8x1xi32> to vector<8x128xi32>
    %17 = arith.cmpi eq, %1, %16 : vector<8x128xi32>
    %18 = arith.extui %17 : vector<8x128xi1> to vector<8x128xi32>
    %19 = arith.sitofp %18 : vector<8x128xi32> to vector<8x128xf32>
    %20 = arith.addf %14, %19 : vector<8x128xf32>
    %21 = vector.extract_strided_slice %0 {offsets = [0, 3], sizes = [8, 1], strides = [1, 1]} : vector<8x8xi32> to vector<8x1xi32>
    %22 = vector.broadcast %21 : vector<8x1xi32> to vector<8x128xi32>
    %23 = arith.cmpi eq, %1, %22 : vector<8x128xi32>
    %24 = arith.extui %23 : vector<8x128xi1> to vector<8x128xi32>
    %25 = arith.sitofp %24 : vector<8x128xi32> to vector<8x128xf32>
    %26 = arith.addf %20, %25 : vector<8x128xf32>
    %27 = vector.extract_strided_slice %0 {offsets = [0, 4], sizes = [8, 1], strides = [1, 1]} : vector<8x8xi32> to vector<8x1xi32>
    %28 = vector.broadcast %27 : vector<8x1xi32> to vector<8x128xi32>
    %29 = arith.cmpi eq, %1, %28 : vector<8x128xi32>
    %30 = arith.extui %29 : vector<8x128xi1> to vector<8x128xi32>
    %31 = arith.sitofp %30 : vector<8x128xi32> to vector<8x128xf32>
    %32 = arith.addf %26, %31 : vector<8x128xf32>
    %33 = vector.extract_strided_slice %0 {offsets = [0, 5], sizes = [8, 1], strides = [1, 1]} : vector<8x8xi32> to vector<8x1xi32>
    %34 = vector.broadcast %33 : vector<8x1xi32> to vector<8x128xi32>
    %35 = arith.cmpi eq, %1, %34 : vector<8x128xi32>
    %36 = arith.extui %35 : vector<8x128xi1> to vector<8x128xi32>
    %37 = arith.sitofp %36 : vector<8x128xi32> to vector<8x128xf32>
    %38 = arith.addf %32, %37 : vector<8x128xf32>
    %39 = vector.extract_strided_slice %0 {offsets = [0, 6], sizes = [8, 1], strides = [1, 1]} : vector<8x8xi32> to vector<8x1xi32>
    %40 = vector.broadcast %39 : vector<8x1xi32> to vector<8x128xi32>
    %41 = arith.cmpi eq, %1, %40 : vector<8x128xi32>
    %42 = arith.extui %41 : vector<8x128xi1> to vector<8x128xi32>
    %43 = arith.sitofp %42 : vector<8x128xi32> to vector<8x128xf32>
    %44 = arith.addf %38, %43 : vector<8x128xf32>
    %45 = vector.extract_strided_slice %0 {offsets = [0, 7], sizes = [8, 1], strides = [1, 1]} : vector<8x8xi32> to vector<8x1xi32>
    %46 = vector.broadcast %45 : vector<8x1xi32> to vector<8x128xi32>
    %47 = arith.cmpi eq, %1, %46 : vector<8x128xi32>
    %48 = arith.extui %47 : vector<8x128xi1> to vector<8x128xi32>
    %49 = arith.sitofp %48 : vector<8x128xi32> to vector<8x128xf32>
    %50 = arith.addf %44, %49 : vector<8x128xf32>
    %c0_1 = arith.constant 0 : index
    %c0_2 = arith.constant 0 : index
    %51 = vector.load %arg2[%c0_1, %c0_2] : memref<128x128xf32, #tpu.memory_space<vmem>>, vector<128x128xf32>
    %cst_3 = arith.constant dense<0.000000e+00> : vector<8x128xf32>
    %52 = tpu.matmul %50, %51, %cst_3 {dimension_numbers = #tpu.dot_dimension_numbers<[1], [0], [0], [1], [0, 0, 1, 1], [], []>} : vector<8x128xf32>, vector<128x128xf32>, vector<8x128xf32> -> vector<8x128xf32>
    %cst_4 = arith.constant 1.250000e-01 : f32
    %53 = vector.broadcast %cst_4 : f32 to vector<8x128xf32>
    %54 = arith.mulf %52, %53 : vector<8x128xf32>
    %c0_5 = arith.constant 0 : index
    %c0_6 = arith.constant 0 : index
    %55 = vector.load %arg3[%c0_5, %c0_6] : memref<128x128xf32, #tpu.memory_space<vmem>>, vector<128x128xf32>
    %cst_7 = arith.constant dense<0.000000e+00> : vector<8x128xf32>
    %56 = tpu.matmul %54, %55, %cst_7 {dimension_numbers = #tpu.dot_dimension_numbers<[1], [0], [0], [1], [0, 0, 1, 1], [], []>} : vector<8x128xf32>, vector<128x128xf32>, vector<8x128xf32> -> vector<8x128xf32>
    %c0_8 = arith.constant 0 : index
    %c0_9 = arith.constant 0 : index
    %57 = vector.load %arg4[%c0_8, %c0_9] : memref<1x128xf32, #tpu.memory_space<vmem>>, vector<1x128xf32>
    %58 = vector.broadcast %57 : vector<1x128xf32> to vector<8x128xf32>
    %59 = arith.addf %56, %58 : vector<8x128xf32>
    %cst_10 = arith.constant 0.000000e+00 : f32
    %60 = vector.broadcast %cst_10 : f32 to vector<8x128xf32>
    %61 = arith.maximumf %59, %60 : vector<8x128xf32>
    %c0_11 = arith.constant 0 : index
    %c0_12 = arith.constant 0 : index
    %62 = vector.load %arg5[%c0_11, %c0_12] : memref<128x128xf32, #tpu.memory_space<vmem>>, vector<128x128xf32>
    %cst_13 = arith.constant dense<0.000000e+00> : vector<8x128xf32>
    %63 = tpu.matmul %61, %62, %cst_13 {dimension_numbers = #tpu.dot_dimension_numbers<[1], [0], [0], [1], [0, 0, 1, 1], [], []>} : vector<8x128xf32>, vector<128x128xf32>, vector<8x128xf32> -> vector<8x128xf32>
    %c0_14 = arith.constant 0 : index
    %c0_15 = arith.constant 0 : index
    %64 = vector.load %arg6[%c0_14, %c0_15] : memref<1x128xf32, #tpu.memory_space<vmem>>, vector<1x128xf32>
    %65 = vector.broadcast %64 : vector<1x128xf32> to vector<8x128xf32>
    %66 = arith.addf %63, %65 : vector<8x128xf32>
    %cst_16 = arith.constant 0.000000e+00 : f32
    %67 = vector.broadcast %cst_16 : f32 to vector<8x128xf32>
    %68 = arith.maximumf %66, %67 : vector<8x128xf32>
    %69 = tpu.iota {dimensions = array<i32: 1>} : vector<8x128xi32>
    %c2_i32 = arith.constant 2 : i32
    %70 = vector.broadcast %c2_i32 : i32 to vector<8x128xi32>
    %71 = arith.cmpi slt, %69, %70 : vector<8x128xi32>
    %cst_17 = arith.constant -1.000000e+30 : f32
    %72 = vector.broadcast %cst_17 : f32 to vector<8x128xf32>
    %73 = arith.select %71, %68, %72 : vector<8x128xi1>, vector<8x128xf32>
    %cst_18 = arith.constant dense<0xFF800000> : vector<8xf32>
    %74 = vector.multi_reduction <maximumf>, %73, %cst_18 [1] : vector<8x128xf32> to vector<8xf32>
    %75 = vector.shape_cast %74 : vector<8xf32> to vector<8x1xf32>
    %76 = vector.broadcast %75 : vector<8x1xf32> to vector<8x128xf32>
    %77 = arith.subf %73, %76 : vector<8x128xf32>
    %78 = math.exp %77 : vector<8x128xf32>
    %cst_19 = arith.constant dense<0.000000e+00> : vector<8xf32>
    %79 = vector.multi_reduction <add>, %78, %cst_19 [1] : vector<8x128xf32> to vector<8xf32>
    %80 = vector.shape_cast %79 : vector<8xf32> to vector<8x1xf32>
    %81 = math.log %80 : vector<8x1xf32>
    %82 = vector.broadcast %81 : vector<8x1xf32> to vector<8x128xf32>
    %83 = arith.subf %77, %82 : vector<8x128xf32>
    %c0_20 = arith.constant 0 : index
    %c0_21 = arith.constant 0 : index
    %84 = vector.load %arg7[%c0_20, %c0_21] : memref<8x128xf32, #tpu.memory_space<vmem>>, vector<8x128xf32>
    tpu.vector_store %arg7[%c0_20, %c0_21], %83 {strides = array<i32>} : memref<8x128xf32, #tpu.memory_space<vmem>>, vector<8x128xf32>,
    return
  }
  func.func @transform_0(%arg0: i32) -> (i32, i32) {
    %c0_i32 = arith.constant 0 : i32
    %c0_i32_0 = arith.constant 0 : i32
    return %arg0, %c0_i32 : i32, i32
  }
  func.func @transform_1(%arg0: i32) -> (i32, i32) {
    %c0_i32 = arith.constant 0 : i32
    %c0_i32_0 = arith.constant 0 : i32
    %c0_i32_1 = arith.constant 0 : i32
    return %c0_i32, %c0_i32_0 : i32, i32
  }
  func.func @transform_2(%arg0: i32) -> (i32, i32) {
    %c0_i32 = arith.constant 0 : i32
    %c0_i32_0 = arith.constant 0 : i32
    %c0_i32_1 = arith.constant 0 : i32
    return %c0_i32, %c0_i32_0 : i32, i32
  }
  func.func @transform_3(%arg0: i32) -> (i32, i32) {
    %c0_i32 = arith.constant 0 : i32
    %c0_i32_0 = arith.constant 0 : i32
    %c0_i32_1 = arith.constant 0 : i32
    return %c0_i32, %c0_i32_0 : i32, i32
  }
  func.func @transform_4(%arg0: i32) -> (i32, i32) {
    %c0_i32 = arith.constant 0 : i32
    %c0_i32_0 = arith.constant 0 : i32
    %c0_i32_1 = arith.constant 0 : i32
    return %c0_i32, %c0_i32_0 : i32, i32
  }
  func.func @transform_5(%arg0: i32) -> (i32, i32) {
    %c0_i32 = arith.constant 0 : i32
    %c0_i32_0 = arith.constant 0 : i32
    %c0_i32_1 = arith.constant 0 : i32
    return %c0_i32, %c0_i32_0 : i32, i32
  }
  func.func @transform_6(%arg0: i32) -> (i32, i32) {
    %c0_i32 = arith.constant 0 : i32
    %c0_i32_0 = arith.constant 0 : i32
    return %arg0, %c0_i32 : i32, i32
  }
}

</mosaic_0001>

<bundles_post_ra>
// kernel: tpu_custom_call.1
= control target key start
LH: loop header
LB: loop body
LE: loop exit
PB: predicated region body
PF: predicated region fallthrough
CT: control target
= control target key end

     0   :  { %11 = vsyncpa [#allocation3], 0  ;;  %s1005_s0 = inlined_call_operand.hbm [shape: s32[8,8], index: 0, kind: input, shape index: {}]   ;;  %s1006_s1 = inlined_call_operand.hbm [shape: f32[128,128], index: 1, kind: input, shape index: {}]   ;;  %s1007_s2 = inlined_call_operand.hbm [shape: f32[128,128], index: 2, kind: input, shape index: {}]   ;;  %s1008_s3 = inlined_call_operand.vmem [shape: f32[1,128], index: 3, kind: input, shape index: {}]   ;;  %s1009_s4 = inlined_call_operand.hbm [shape: f32[128,128], index: 4, kind: input, shape index: {}]   ;;  %s1010_s5 = inlined_call_operand.vmem [shape: f32[1,128], index: 5, kind: input, shape index: {}]   ;;  %s1011_s6 = inlined_call_operand.hbm [shape: f32[8,128], index: 6, kind: output, shape index: {}]  }
   0x1   :  { %12 = vsyncpa [#allocation6], 0 }
   0x2   :  { %13 = vsyncpa [#allocation9], 0 }
   0x3   :  { %14 = vsyncpa [#allocation4], 0  ;;  %s828_s21 = smov [#allocation5]   ;;  %s710_s25 = scalar_lea.hbm %s1006_s1, 2048 }
   0x4   :  { %s30_s22 = sshll.u32 %s828_s21, 4  ;;  %p711_p0 = scmp.ne.s32.totalorder %s1006_s1, %s710_s25  ;;  %s31_s22 = int_to_ptr.vmem [resolvable:$true] %s30_s22 }
   0x5   :  { %p714_p1 = scmp.lt.u32.totalorder %s710_s25, %s1006_s1 }
   0x7   :  { %p716_p2 = pnand %p714_p1, %p711_p0 }
   0x9   :  { %719 = shalt.err (!%p716_p2)
}
   0xa   :  { %s720_s30 = scalar_lea.vmem %s31_s22, 2048  ;;  %p725_p4 = scmp.lt.s32.totalorder %s31_s22, %s31_s22 }
   0xb   :  { %p721_p3 = scmp.ne.s32.totalorder %s31_s22, %s720_s30  ;;  %p726_p5 = scmp.lt.s32.totalorder %s720_s30, %s720_s30 }
   0xd   :  { %p727_p6 = por %p726_p5, %p725_p4 }
   0xf   :  { %p728_p7 = pnand %p727_p6, %p721_p3 }
  0x11   :  { %731 = shalt.err (!%p728_p7)
}
  0x12   :  { %s829_s7 = smov 128   ;;  %s830_s8 = smov 8  }
  0x13   :  { %36 = dma.hbm_to_vmem [thread:$0]  %s1006_s1, 2048, %s31_s22, [#allocation6], %s829_s7, %s829_s7, %s830_s8  }
  0x14   :  { %s831_s11 = smov [#allocation2]   ;;  %s832_s13 = smov [#allocation7]  }
  0x15   :  { %s21_s12 = sshll.u32 %s831_s11, 4  ;;  %s42_s14 = sshll.u32 %s832_s13, 4  ;;  %s22_s12 = int_to_ptr.vmem [resolvable:$true] %s21_s12  ;;  %s43_s14 = int_to_ptr.vmem [resolvable:$true] %s42_s14 }
  0x16   :  { %s732_s17 = scalar_lea.hbm %s1005_s0, 128 }
  0x17   :  { %p733_p8 = scmp.ne.s32.totalorder %s1005_s0, %s732_s17  ;;  %p736_p9 = scmp.lt.u32.totalorder %s732_s17, %s1005_s0 }
  0x19   :  { %p738_p10 = pnand %p736_p9, %p733_p8 }
  0x1b   :  { %741 = shalt.err (!%p738_p10)
}
  0x1c   :  { %s742_s1 = scalar_lea.vmem %s22_s12, 128  ;;  %p747_p12 = scmp.lt.s32.totalorder %s22_s12, %s22_s12 }
  0x1d   :  { %p743_p11 = scmp.ne.s32.totalorder %s22_s12, %s742_s1  ;;  %p748_p13 = scmp.lt.s32.totalorder %s742_s1, %s742_s1 }
  0x1f   :  { %p749_p0 = por %p748_p13, %p747_p12 }
  0x21   :  { %p750_p1 = pnand %p749_p0, %p743_p11 }
  0x23   :  { %753 = shalt.err (!%p750_p1)
}
  0x24   :  { %24 = dma.hbm_to_vmem [thread:$0]  %s1005_s0, 128, %s22_s12, [#allocation3]  }
  0x25   :  { %s754_s26 = scalar_lea.hbm %s1007_s2, 2048 }
  0x26   :  { %p755_p2 = scmp.ne.s32.totalorder %s1007_s2, %s754_s26  ;;  %p758_p3 = scmp.lt.u32.totalorder %s754_s26, %s1007_s2 }
  0x28   :  { %p760_p4 = pnand %p758_p3, %p755_p2 }
  0x2a   :  { %763 = shalt.err (!%p760_p4)
}
  0x2b   :  { %s764_s9 = scalar_lea.vmem %s43_s14, 2048  ;;  %p769_p6 = scmp.lt.s32.totalorder %s43_s14, %s43_s14 }
  0x2c   :  { %p765_p5 = scmp.ne.s32.totalorder %s43_s14, %s764_s9  ;;  %p770_p7 = scmp.lt.s32.totalorder %s764_s9, %s764_s9 }
  0x2e   :  { %p771_p8 = por %p770_p7, %p769_p6 }
  0x30   :  { %p772_p9 = pnand %p771_p8, %p765_p5 }
  0x32   :  { %775 = shalt.err (!%p772_p9)
}
  0x33   :  { %48 = dma.hbm_to_vmem [thread:$0]  %s1007_s2, 2048, %s43_s14, [#allocation6], %s829_s7, %s829_s7, %s830_s8  }
  0x34   :  { %s833_s11 = smov [#allocation8]   ;;  %s776_s16 = scalar_lea.hbm %s1009_s4, 2048 }
  0x35   :  { %s56_s12 = sshll.u32 %s833_s11, 4  ;;  %p777_p10 = scmp.ne.s32.totalorder %s1009_s4, %s776_s16  ;;  %s57_s12 = int_to_ptr.vmem [resolvable:$true] %s56_s12 }
  0x36   :  { %p780_p11 = scmp.lt.u32.totalorder %s776_s16, %s1009_s4 }
  0x38   :  { %p782_p12 = pnand %p780_p11, %p777_p10 }
  0x3a   :  { %785 = shalt.err (!%p782_p12)
}
  0x3b   :  { %s786_s21 = scalar_lea.vmem %s57_s12, 2048  ;;  %p791_p0 = scmp.lt.s32.totalorder %s57_s12, %s57_s12 }
  0x3c   :  { %p787_p13 = scmp.ne.s32.totalorder %s57_s12, %s786_s21  ;;  %p792_p1 = scmp.lt.s32.totalorder %s786_s21, %s786_s21 }
  0x3e   :  { %p793_p2 = por %p792_p1, %p791_p0 }
  0x40   :  { %p794_p3 = pnand %p793_p2, %p787_p13 }
  0x42   :  { %797 = shalt.err (!%p794_p3)
}
  0x43   :  { %62 = dma.hbm_to_vmem [thread:$0]  %s1009_s4, 2048, %s57_s12, [#allocation9], %s829_s7, %s829_s7, %s830_s8  }
  0x44   :  { %820 = dma.done.wait [#allocation3], 128  }
  0x45   :  { %821 = vsyncadd [#allocation3], 4294967168 }
  0x46   :  { %822 = dma.done.wait [#allocation6], 4096  }
  0x47   :  { %823 = vsyncadd [#allocation6], 4294963200 }
  0x48   :  { %824 = dma.done.wait [#allocation9], 2048  }
  0x49   :  { %825 = vsyncadd [#allocation9], 4294965248  ;;  %v834_v0 = vmov 2   ;;  %v835_v1 = vmov 0   ;;  %v836_v2 = vmov 0.0|0.0   ;;  %v77_v3 = vld [vmem:[#allocation2] sm:$0xff]  ;;  %v78_v56 = vlaneseq }
  0x4a   :  { %699 = vset.pattern.permute.xlu1 %v834_v0  ;;  %697 = vset.pattern.permute.xlu0 %v835_v1  ;;  %v136_v4 = vld [vmem:[#allocation5] sm:$0xff]  ;;  %v137_v5 = vld [vmem:[#allocation5 + $0x8] sm:$0xff]  ;;  %v138_v7 = vld [vmem:[#allocation5 + $0x10] sm:$0xff]  ;;  %v837_v10 = vmov 3   ;;  %v838_v11 = vmov 1   ;;  %v839_v17 = vmov 4  }
  0x4b   :  { %607 = vmatprep.subr.bf16.mxu0 %v836_v2  ;;  %631 = vmatprep.subr.bf16.mxu1 %v836_v2  ;;  %v608_v6 = vpack.c.bf16 %v137_v5, %v136_v4  ;;  %v139_v8 = vld [vmem:[#allocation5 + $0x18] sm:$0xff]  ;;  %v140_v12 = vld [vmem:[#allocation5 + $0x20] sm:$0xff]  ;;  %v141_v13 = vld [vmem:[#allocation5 + $0x28] sm:$0xff]  ;;  %v840_v18 = vmov 5   ;;  %v841_v22 = vmov 6   ;;  %v842_v23 = vmov 7  }
  0x4c   :  { %95 = vperm.xlu1 %699, %v77_v3   ;;  %81 = vperm.xlu0 %697, %v77_v3   ;;  %v611_v9 = vpack.c.bf16 %v139_v8, %v138_v7  ;;  %v614_v14 = vpack.c.bf16 %v141_v13, %v140_v12  ;;  %v142_v15 = vld [vmem:[#allocation5 + $0x30] sm:$0xff]  ;;  %v143_v16 = vld [vmem:[#allocation5 + $0x38] sm:$0xff]  ;;  %v144_v20 = vld [vmem:[#allocation5 + $0x40] sm:$0xff]  ;;  %vm843_vm0 = vmmov 0   ;;  %v844_v33 = vmov 0.0  }
  0x4d   :  { %609 = vmatpush3.bf16.msra.mxu0 %v608_v6  ;;  %v617_v19 = vpack.c.bf16 %v143_v16, %v142_v15  ;;  %v145_v21 = vld [vmem:[#allocation5 + $0x48] sm:$0xff]  ;;  %v146_v25 = vld [vmem:[#allocation5 + $0x50] sm:$0xff]  ;;  %v147_v26 = vld [vmem:[#allocation5 + $0x58] sm:$0xff]  ;;  %534 = vmatprep.mubr.msk.f32.mxu0 %vm843_vm0, %v844_v33  ;;  %v959_v59 = vand.u32 127, %v78_v56 }
  0x4e   :  { %610 = vmatprep.subr.bf16.mxu0 %v836_v2  ;;  %v620_v24 = vpack.c.bf16 %v145_v21, %v144_v20  ;;  %v623_v27 = vpack.c.bf16 %v147_v26, %v146_v25  ;;  %v148_v28 = vld [vmem:[#allocation5 + $0x60] sm:$0xff]  ;;  %v149_v29 = vld [vmem:[#allocation5 + $0x68] sm:$0xff]  ;;  %v150_v31 = vld [vmem:[#allocation5 + $0x70] sm:$0xff]  ;;  %569 = vmatprep.mubr.msk.f32.mxu1 %vm843_vm0, %v844_v33 }
  0x4f   :  { %v626_v30 = vpack.c.bf16 %v149_v29, %v148_v28  ;;  %v151_v32 = vld [vmem:[#allocation5 + $0x78] sm:$0xff]  ;;  %v223_v34 = vld [vmem:[#allocation7] sm:$0xff]  ;;  %v224_v35 = vld [vmem:[#allocation7 + $0x8] sm:$0xff]  ;;  %vm411_vm9 = vcmp.lt.s32.totalorder %v959_v59, 2 }
  0x50   :  { %700 = vset.pattern.permute.xlu1 %v837_v10  ;;  %698 = vset.pattern.permute.xlu0 %v838_v11  ;;  %v225_v36 = vld [vmem:[#allocation7 + $0x10] sm:$0xff]  ;;  %v632_v37 = vpack.c.bf16 %v224_v35, %v223_v34  ;;  %v226_v38 = vld [vmem:[#allocation7 + $0x18] sm:$0xff]  ;;  %v629_v39 = vpack.c.bf16 %v151_v32, %v150_v31  ;;  %v227_v41 = vld [vmem:[#allocation7 + $0x20] sm:$0xff] }
  0x51   :  { %102 = vperm.xlu1 %700, %v77_v3   ;;  %88 = vperm.xlu0 %698, %v77_v3   ;;  %v635_v40 = vpack.c.bf16 %v226_v38, %v225_v36  ;;  %v228_v42 = vld [vmem:[#allocation7 + $0x28] sm:$0xff]  ;;  %v229_v44 = vld [vmem:[#allocation7 + $0x30] sm:$0xff]  ;;  %v230_v45 = vld [vmem:[#allocation7 + $0x38] sm:$0xff] }
  0x52   :  { %612 = vmatpush3.bf16.msra.mxu0 %v611_v9  ;;  %633 = vmatpush3.bf16.msra.mxu1 %v632_v37  ;;  %v638_v43 = vpack.c.bf16 %v228_v42, %v227_v41  ;;  %v641_v46 = vpack.c.bf16 %v230_v45, %v229_v44  ;;  %v231_v47 = vld [vmem:[#allocation7 + $0x40] sm:$0xff]  ;;  %v232_v48 = vld [vmem:[#allocation7 + $0x48] sm:$0xff]  ;;  %v233_v50 = vld [vmem:[#allocation7 + $0x50] sm:$0xff] }
  0x53   :  { %613 = vmatprep.subr.bf16.mxu0 %v836_v2  ;;  %634 = vmatprep.subr.bf16.mxu1 %v836_v2  ;;  %v644_v49 = vpack.c.bf16 %v232_v48, %v231_v47  ;;  %v234_v51 = vld [vmem:[#allocation7 + $0x58] sm:$0xff]  ;;  %v235_v53 = vld [vmem:[#allocation7 + $0x60] sm:$0xff]  ;;  %v236_v54 = vld [vmem:[#allocation7 + $0x68] sm:$0xff] }
  0x54   :  { %v647_v52 = vpack.c.bf16 %v234_v51, %v233_v50  ;;  %v650_v55 = vpack.c.bf16 %v236_v54, %v235_v53  ;;  %v317_v21 = vld [vmem:[#allocation8] sm:$0xff]  ;;  %v320_v25 = vld [vmem:[#allocation8 + $0x18] sm:$0xff]  ;;  %v322_v28 = vld [vmem:[#allocation8 + $0x28] sm:$0xff] }
  0x55   :  { %701 = vset.pattern.permute.xlu1 %v839_v17  ;;  %702 = vset.pattern.permute.xlu0 %v840_v18  ;;  %v237_v18 = vld [vmem:[#allocation7 + $0x70] sm:$0xff]  ;;  %v324_v31 = vld [vmem:[#allocation8 + $0x38] sm:$0xff]  ;;  %v326_v34 = vld [vmem:[#allocation8 + $0x48] sm:$0xff] }
  0x56   :  { %109 = vperm.xlu1 %701, %v77_v3   ;;  %116 = vperm.xlu0 %702, %v77_v3   ;;  %v327_v36 = vld [vmem:[#allocation8 + $0x50] sm:$0xff]  ;;  %v328_v37 = vld [vmem:[#allocation8 + $0x58] sm:$0xff] }
  0x57   :  { %615 = vmatpush3.bf16.msra.mxu0 %v614_v14  ;;  %636 = vmatpush3.bf16.msra.mxu1 %v635_v40  ;;  %v671_v38 = vpack.c.bf16 %v328_v37, %v327_v36  ;;  %v330_v40 = vld [vmem:[#allocation8 + $0x68] sm:$0xff]  ;;  %v331_v45 = vld [vmem:[#allocation8 + $0x70] sm:$0xff]  ;;  %v449_v48 = vld [vmem:[%s1008_s3] ss:$0 sm:$0xff]  ;;  %s845_s3 = smov [#allocation10]  }
  0x58   :  { %616 = vmatprep.subr.bf16.mxu0 %v836_v2  ;;  %637 = vmatprep.subr.bf16.mxu1 %v836_v2  ;;  %s430_s22 = sshll.u32 %s845_s3, 4  ;;  %s431_s22 = int_to_ptr.vmem [resolvable:$true] %s430_s22 }
  0x59   :  { %p803_p5 = scmp.lt.s32.totalorder %s431_s22, %s431_s22 }
  0x5a   :  { %703 = vset.pattern.permute.xlu1 %v841_v22  ;;  %705 = vset.pattern.permute.xlu0 %v842_v23  ;;  %v318_v22 = vld [vmem:[#allocation8 + $0x8] sm:$0xff] }
  0x5b   :  { %123 = vperm.xlu1 %703, %v77_v3   ;;  %618 = vmatpush3.bf16.msra.mxu0 %v617_v19  ;;  %v238_v19 = vld [vmem:[#allocation7 + $0x78] sm:$0xff] }
  0x5c   :  { %619 = vmatprep.subr.bf16.mxu0 %v836_v2  ;;  %639 = vmatpush3.bf16.msra.mxu1 %v638_v43  ;;  %v653_v20 = vpack.c.bf16 %v238_v19, %v237_v18 }
  0x5d   :  { %640 = vmatprep.subr.bf16.mxu1 %v836_v2 }
  0x5f   :  { %704 = vset.pattern.permute.xlu1 %v842_v23  ;;  %621 = vmatpush3.bf16.msra.mxu0 %v620_v24  ;;  %v319_v23 = vld [vmem:[#allocation8 + $0x10] sm:$0xff]  ;;  %v656_v24 = vpack.c.bf16 %v318_v22, %v317_v21 }
  0x60   :  { %130 = vperm.xlu1 %704, %v77_v3   ;;  %622 = vmatprep.subr.bf16.mxu0 %v836_v2  ;;  %v659_v26 = vpack.c.bf16 %v320_v25, %v319_v23 }
  0x61   :  { %642 = vmatpush3.bf16.msra.mxu1 %v641_v46  ;;  %v332_v46 = vld [vmem:[#allocation8 + $0x78] sm:$0xff] }
  0x62   :  { %643 = vmatprep.subr.bf16.mxu1 %v836_v2  ;;  %v677_v47 = vpack.c.bf16 %v332_v46, %v331_v45 }
  0x63   :  { %624 = vmatpush3.bf16.msra.mxu0 %v623_v27  ;;  %v321_v27 = vld [vmem:[#allocation8 + $0x20] sm:$0xff] }
  0x64   :  { %625 = vmatprep.subr.bf16.mxu0 %v836_v2  ;;  %v662_v29 = vpack.c.bf16 %v322_v28, %v321_v27 }
  0x65   :  { %645 = vmatpush3.bf16.msra.mxu1 %v644_v49 }
  0x66   :  { %646 = vmatprep.subr.bf16.mxu1 %v836_v2 }
  0x67   :  { %627 = vmatpush3.bf16.msra.mxu0 %v626_v30  ;;  %v323_v30 = vld [vmem:[#allocation8 + $0x30] sm:$0xff] }
  0x68   :  { %628 = vmatprep.subr.bf16.mxu0 %v836_v2  ;;  %v665_v32 = vpack.c.bf16 %v324_v31, %v323_v30 }
  0x69   :  { %648 = vmatpush3.bf16.msra.mxu1 %v647_v52 }
  0x6a   :  { %649 = vmatprep.subr.bf16.mxu1 %v836_v2 }
  0x6b   :  { %630 = vmatpush3.bf16.msra.mxu0 %v629_v39  ;;  %v329_v39 = vld [vmem:[#allocation8 + $0x60] sm:$0xff] }
  0x6c   :  { %655 = vmatprep.subr.bf16.mxu0 %v836_v2  ;;  %v674_v41 = vpack.c.bf16 %v330_v40, %v329_v39 }
  0x6d   :  { %651 = vmatpush3.bf16.msra.mxu1 %v650_v55 }
  0x6e   :  { %652 = vmatprep.subr.bf16.mxu1 %v836_v2 }
  0x71   :  { %654 = vmatpush3.bf16.msra.mxu1 %v653_v20 }
  0xcb   :  { %v96_v57 = vpop.permute.xlu1 %95  ;;  %v82_v58 = vpop.permute.xlu0 %81 }
  0xcc   :  { %vm83_vm1 = vcmp.eq.s32.totalorder %v959_v59, %v82_v58  ;;  %vm97_vm2 = vcmp.eq.s32.totalorder %v959_v59, %v96_v57 }
  0xcd   :  { %v441_v62 = vsel %vm83_vm1, 1.0, %v844_v33  ;;  %v443_v1 = vsel %vm97_vm2, 1.0, %v844_v33 }
  0xd0   :  { %v103_v60 = vpop.permute.xlu1 %102  ;;  %v89_v61 = vpop.permute.xlu0 %88 }
  0xd1   :  { %vm90_vm3 = vcmp.eq.s32.totalorder %v959_v59, %v89_v61  ;;  %vm104_vm4 = vcmp.eq.s32.totalorder %v959_v59, %v103_v60 }
  0xd2   :  { %v442_v63 = vsel %vm90_vm3, 1.0, %v844_v33  ;;  %v444_v6 = vsel %vm104_vm4, 1.0, %v844_v33 }
  0xd3   :  { %v93_v0 = vadd.f32 %v442_v63, %v441_v62 }
  0xd5   :  { %v100_v3 = vadd.f32 %v443_v1, %v93_v0  ;;  %v110_v4 = vpop.permute.xlu1 %109  ;;  %v117_v5 = vpop.permute.xlu0 %116 }
  0xd6   :  { %vm111_vm5 = vcmp.eq.s32.totalorder %v959_v59, %v110_v4  ;;  %vm118_vm6 = vcmp.eq.s32.totalorder %v959_v59, %v117_v5 }
  0xd7   :  { %v107_v7 = vadd.f32 %v444_v6, %v100_v3  ;;  %v445_v8 = vsel %vm111_vm5, 1.0, %v844_v33  ;;  %v446_v10 = vsel %vm118_vm6, 1.0, %v844_v33 }
  0xd9   :  { %v114_v9 = vadd.f32 %v445_v8, %v107_v7 }
  0xda   :  { %v124_v11 = vpop.permute.xlu1 %123 }
  0xdb   :  { %vm125_vm7 = vcmp.eq.s32.totalorder %v959_v59, %v124_v11  ;;  %v121_v12 = vadd.f32 %v446_v10, %v114_v9 }
  0xdc   :  { %v447_v13 = vsel %vm125_vm7, 1.0, %v844_v33 }
  0xdd   :  { %v128_v15 = vadd.f32 %v447_v13, %v121_v12 }
  0xdf   :  { %v131_v14 = vpop.permute.xlu1 %130 }
  0xe0   :  { %vm132_vm8 = vcmp.eq.s32.totalorder %v959_v59, %v131_v14 }
  0xe1   :  { %v448_v16 = vsel %vm132_vm8, 1.0, %v844_v33 }
  0xe2   :  { %v135_v17 = vadd.f32 %v448_v16, %v128_v15 }
  0xe4   :  { %535 = vmatmul.mubr.f32.vlgmr.msra.gmra.mrb[0].mxu0 %v135_v17 }
  0xe5   :  { %604 = vmatprep.mubr.msk.f32.mxu0 %vm843_vm0, %v844_v33  ;;  %657 = vmatpush3.bf16.msra.mxu0 %v656_v24  ;;  %v325_v33 = vld [vmem:[#allocation8 + $0x40] sm:$0xff] }
  0xe6   :  { %658 = vmatprep.subr.bf16.mxu0 %v836_v2  ;;  %v668_v35 = vpack.c.bf16 %v326_v34, %v325_v33 }
  0xe9   :  { %660 = vmatpush3.bf16.msra.mxu0 %v659_v26 }
  0xea   :  { %661 = vmatprep.subr.bf16.mxu0 %v836_v2 }
  0xed   :  { %663 = vmatpush3.bf16.msra.mxu0 %v662_v29 }
  0xee   :  { %664 = vmatprep.subr.bf16.mxu0 %v836_v2 }
  0xf1   :  { %666 = vmatpush3.bf16.msra.mxu0 %v665_v32 }
  0xf2   :  { %667 = vmatprep.subr.bf16.mxu0 %v836_v2 }
  0xf5   :  { %669 = vmatpush3.bf16.msra.mxu0 %v668_v35 }
  0xf6   :  { %670 = vmatprep.subr.bf16.mxu0 %v836_v2 }
  0xf9   :  { %672 = vmatpush3.bf16.msra.mxu0 %v671_v38 }
  0xfa   :  { %673 = vmatprep.subr.bf16.mxu0 %v836_v2 }
  0xfd   :  { %675 = vmatpush3.bf16.msra.mxu0 %v674_v41 }
  0xfe   :  { %676 = vmatprep.subr.bf16.mxu0 %v836_v2  ;;  %v450_v2 = vld [vmem:[%s1010_s5] ss:$0 sm:$0xff]  ;;  %s798_s5 = scalar_lea.vmem %s431_s22, 128 }
  0xff   :  { %p799_p4 = scmp.ne.s32.totalorder %s431_s22, %s798_s5  ;;  %p804_p6 = scmp.lt.s32.totalorder %s798_s5, %s798_s5 }
 0x101   :  { %678 = vmatpush3.bf16.msra.mxu0 %v677_v47  ;;  %p805_p7 = por %p804_p6, %p803_p5 }
 0x103   :  { %p806_p8 = pnand %p805_p7, %p799_p4 }
 0x1b7   :  { %v218_v42 = vpop.f32.mrb[0].mxu0 }
 0x1b8   :  { %v222_v43 = vmul.f32 0.125, %v218_v42  ;;  %v536_v44 = vpop.f32.mrb[1].mxu0 }
 0x1ba   :  { %570 = vmatmul.mubr.f32.vlgmr.msra.gmra.mrb[0].mxu1 %v222_v43 }
 0x28d   :  { %v312_v49 = vpop.f32.mrb[0].mxu1 }
 0x28e   :  { %v313_v50 = vadd.f32 %v449_v48, %v312_v49  ;;  %v571_v51 = vpop.f32.mrb[1].mxu1 }
 0x290   :  { %v316_v52 = vmax.f32 %v313_v50, 0.0 }
 0x292   :  { %605 = vmatmul.mubr.f32.vlgmr.msra.gmra.mrb[2].mxu0 %v316_v52 }
 0x365   :  { %v406_v53 = vpop.f32.mrb[2].mxu0 }
 0x366   :  { %v407_v54 = vadd.f32 %v450_v2, %v406_v53  ;;  %v606_v55 = vpop.f32.mrb[3].mxu0 }
 0x368   :  { %v410_v56 = vmax.f32 %v407_v54, 0.0 }
 0x36a   :  { %v412_v57 = vsel %vm411_vm9, %v410_v56, -1e+30 }
 0x36b   :  { %413 = vmax.xlane.f32.xlu0 %v412_v57 }
 0x3f8   :  { %v414_v58 = vpop.xlane.xlu0 %413 }
 0x3f9   :  { %v415_v60 = vsub.f32 %v412_v57, %v414_v58 }
 0x3fb   :  { %v416_v61 = vmul.f32 1.442695, %v415_v60 }
 0x3fd   :  { %706 = vpow2.f32 %v416_v61 }
 0x407   :  { %v707_v62 = vpop.eup %706 }
 0x408   :  { %418 = vadd.xlane.f32.xlu1 %v707_v62 }
 0x495   :  { %v419_v63 = vpop.xlane.xlu1 %418 }
 0x496   :  { %708 = vlog2.f32 %v419_v63 }
 0x4a0   :  { %v709_v0 = vpop.eup %708 }
 0x4a1   :  { %v421_v1 = vmul.f32 0.6931472, %v709_v0 }
 0x4a3   :  { %v422_v3 = vsub.f32 %v415_v60, %v421_v1 }
 0x4a5   :  { %423 = vst [vmem:[#allocation10] sm:$0xff] %v422_v3 }
 0x4a6   :  { %809 = shalt.err (!%p806_p8)
}
 0x4a7   :  { %s810_s25 = scalar_lea.hbm %s1011_s6, 128 }
 0x4a8   :  { %p811_p9 = scmp.ne.s32.totalorder %s1011_s6, %s810_s25  ;;  %p814_p10 = scmp.lt.u32.totalorder %s810_s25, %s1011_s6 }
 0x4aa   :  { %p816_p11 = pnand %p814_p10, %p811_p9 }
 0x4ac   :  { %819 = shalt.err (!%p816_p11)
}
 0x4ad   :  { %433 = dma.vmem_to_hbm [thread:$0]  %s431_s22, 128, %s1011_s6, [#allocation4]  }
 0x4ae   :  { %826 = dma.done.wait [#allocation4], 128  }
 0x4af   :  { %827 = vsyncadd [#allocation4], 4294967168 }
 0x4b0   :  { %437 = vsyncpa [#allocation3], 1 }
 0x4b1   :  { %438 = vsyncpa [#allocation6], 1 }
 0x4b2   :  { %439 = vsyncpa [#allocation9], 1 }
 0x4b3   :  { %440 = vsyncpa [#allocation4], 1 }

</bundles_post_ra>
